<compile_context>
chip_gen: v7x
topology: tpu7x:2x2x1
jax: 0.10.0
libtpu: 0.0.40
codegen_flags: <defaults>
</compile_context>

<pallas_src>
import functools

import jax
import jax.numpy as jnp
from jax.experimental import pallas as pl
from jax.experimental.pallas import tpu as pltpu


def _round_up(x, m):
    return ((x + m - 1) // m) * m


def _rmsnorm_lmhead_kernel(x_ref, g_ref, w_ref, o_ref, xn_ref, *, eps):
    """grid = (row tiles, vocab tiles); vocab is the inner ("arbitrary") axis.

    x_ref : [tm, D]  f32 activations for this row tile (re-DMA'd only when i changes)
    g_ref : [1, D]   f32 RMSNorm gain (resident)
    w_ref : [tv, D]  bf16 tied lm_head weight tile (streamed over vocab)
    o_ref : [tm, tv] logits tile
    xn_ref: [tm, D]  bf16 scratch: normalized rows, computed once per row tile.
    """

    @pl.when(pl.program_id(1) == 0)
    def _():
        x = x_ref[...].astype(jnp.float32)
        g = g_ref[...].astype(jnp.float32)
        ms = jnp.mean(x * x, axis=-1, keepdims=True)          # [tm, 1]
        xn = x * jax.lax.rsqrt(ms + eps) * g                  # gamma folded in once
        xn_ref[...] = xn.astype(xn_ref.dtype)

    # Contract shared D axis directly on the [*, D] layouts (no transpose copy).
    o_ref[...] = jax.lax.dot_general(
        xn_ref[...],
        w_ref[...],
        dimension_numbers=(((1,), (1,)), ((), ())),
        preferred_element_type=jnp.float32,
    ).astype(o_ref.dtype)


def rmsnorm_lmhead(x_flat, gamma, emb_weight, *, eps, tm=None, tv=512,
                   out_dtype=jnp.float32):
    """Fused RMSNorm + tied lm_head.

    x_flat:     [N, D] f32
    gamma:      [D]    f32
    emb_weight: [V, D] (streamed as bf16)
    returns     [N, V] out_dtype logits
    """
    N, D = x_flat.shape
    V, D2 = emb_weight.shape
    assert D == D2

    # --- row (N) tiling ------------------------------------------------------
    if tm is None:
        tm = 256 if N >= 256 else _round_up(max(N, 8), 8)
    tm = _round_up(tm, 8)
    Np = _round_up(N, tm)

    # --- vocab (V) tiling; pad V so the output stays lane-dense ---------------
    tv = min(_round_up(tv, 128), _round_up(V, 128))
    Vp = _round_up(V, tv)

    x_p = x_flat if Np == N else jnp.pad(x_flat, ((0, Np - N), (0, 0)))
    w_bf16 = emb_weight.astype(jnp.bfloat16)
    if Vp != V:
        w_bf16 = jnp.pad(w_bf16, ((0, Vp - V), (0, 0)))

    grid = (Np // tm, Vp // tv)

    # Working set: x (2x buffered) + xn scratch + weight (2x) + out (2x) + gain.
    out_bytes = jnp.dtype(out_dtype).itemsize
    need = (2 * tm * D * 4) + (tm * D * 2) + (2 * tv * D * 2) \
        + (2 * tm * tv * out_bytes) + D * 4
    vmem_limit = int(min(48 * 2**20, max(32 * 2**20, 2 * need)))

    kernel = functools.partial(_rmsnorm_lmhead_kernel, eps=eps)
    out = pl.pallas_call(
        kernel,
        out_shape=jax.ShapeDtypeStruct((Np, Vp), out_dtype),
        grid_spec=pltpu.PrefetchScalarGridSpec(
            num_scalar_prefetch=0,
            grid=grid,
            in_specs=[
                pl.BlockSpec((tm, D), lambda i, j: (i, 0)),   # activations per row tile
                pl.BlockSpec((1, D), lambda i, j: (0, 0)),    # rmsnorm gain (resident)
                pl.BlockSpec((tv, D), lambda i, j: (j, 0)),   # weight stream (inner axis)
            ],
            out_specs=pl.BlockSpec((tm, tv), lambda i, j: (i, j)),
            scratch_shapes=[pltpu.VMEM((tm, D), jnp.bfloat16)],
        ),
        compiler_params=pltpu.CompilerParams(
            dimension_semantics=("parallel", "arbitrary"),
            vmem_limit_bytes=vmem_limit,
        ),
    )(x_p, gamma.reshape(1, D), w_bf16)

    if Np != N or Vp != V:
        out = out[:N, :V]
    return out


class LMParams:
    """Deterministic synthetic parameters matching LM.__init__ shapes."""

    def __init__(self, key, vocab_size, d_model):
        (k_emb,) = jax.random.split(key, 1)
        # nn.Embedding + _init_weights -> normal(0, 0.02); lm_head weight tied to it.
        # (The padding_idx row is overwritten by _init_weights in the reference too.)
        self.embedding = (
            0.02 * jax.random.normal(k_emb, (vocab_size, d_model), jnp.float32)
        )
        # RMSNorm weight initialized to ones.
        self.out_norm_gamma = jnp.ones((d_model,), jnp.float32)


def lm_forward(params, tokens, *, norm_eps=1e-5, tm=None, tv=512):
    B, T = tokens.shape
    V, D = params.embedding.shape
    # Embedding lookup (gather) — glue in plain JAX.
    x = jnp.take(params.embedding, tokens, axis=0)            # [B, T, D]
    # TODO(synk): self.core (RNN / Transformer / Mamba) is not defined in the
    # provided source; treated as identity here rather than inventing semantics.
    x_flat = x.reshape(B * T, D)
    logits = rmsnorm_lmhead(
        x_flat, params.out_norm_gamma, params.embedding,
        eps=norm_eps, tm=tm, tv=tv,
    )
    return logits.reshape(B, T, V)


if __name__ == "__main__":
    B, T = 2, 16
    D_MODEL = 128
    VOCAB = 500  # deliberately not a multiple of 128 to exercise vocab padding

    key = jax.random.PRNGKey(0)
    k_param, k_tok = jax.random.split(key)
    params = LMParams(k_param, VOCAB, D_MODEL)
    tokens = jax.random.randint(k_tok, (B, T), 0, VOCAB, dtype=jnp.int32)

    # tv=128 at toy shapes so the vocab loop (and the hoisted-RMSNorm scratch
    # carry across the "arbitrary" axis) actually gets exercised.
    logits = jax.block_until_ready(lm_forward(params, tokens, tv=128))

    # Pure-JAX f32 reference of the same math (kernel matmul runs in bf16 with
    # f32 accumulation, so allow ~1e-2 level differences).
    x = jnp.take(params.embedding, tokens, axis=0)
    ms = jnp.mean(x * x, axis=-1, keepdims=True)
    xn = x * jax.lax.rsqrt(ms + 1e-5) * params.out_norm_gamma
    ref = jnp.einsum("btd,vd->btv", xn, params.embedding)

    assert logits.shape == (B, T, VOCAB)
    assert jnp.allclose(logits, ref, atol=3e-2, rtol=3e-2), (
        float(jnp.max(jnp.abs(logits - ref)))
    )

    print("KERNEL_OK")
</pallas_src>

<mosaic_0001>
module attributes {stable_mosaic.version = 11 : i64} {
  func.func @_rmsnorm_lmhead_kernel(%arg0: i32, %arg1: i32, %arg2: memref<32x128xf32, #tpu.memory_space<vmem>>, %arg3: memref<1x128xf32, #tpu.memory_space<vmem>>, %arg4: memref<128x128xbf16, #tpu.memory_space<vmem>>, %arg5: memref<32x128xf32, #tpu.memory_space<vmem>>, %arg6: memref<32x128xbf16, #tpu.memory_space<vmem>>) attributes {dimension_semantics = [#tpu.dimension_semantics<parallel>, #tpu.dimension_semantics<arbitrary>], iteration_bounds = array<i64: 1, 4>, scalar_prefetch = 0 : i64, scratch_operands = 1 : i64, tpu.core_type = #tpu.core_type<tc>, window_params = [{transform_indices = @transform_0, window_bounds = array<i64: 32, 128>}, {pipeline_mode = #tpu.pipeline_mode<synchronous>, transform_indices = @transform_1, window_bounds = array<i64: 1, 128>}, {transform_indices = @transform_2, window_bounds = array<i64: 128, 128>}, {transform_indices = @transform_3, window_bounds = array<i64: 32, 128>}]} {
    %c0_i32 = arith.constant 0 : i32
    %0 = arith.cmpi eq, %arg1, %c0_i32 : i32
    %1 = arith.extui %0 : i1 to i32
    %c0_i32_0 = arith.constant 0 : i32
    %2 = arith.cmpi ne, %1, %c0_i32_0 : i32
    scf.if %2 {
      %c0_6 = arith.constant 0 : index
      %c0_7 = arith.constant 0 : index
      %7 = vector.load %arg2[%c0_6, %c0_7] : memref<32x128xf32, #tpu.memory_space<vmem>>, vector<32x128xf32>
      %c0_8 = arith.constant 0 : index
      %c0_9 = arith.constant 0 : index
      %8 = vector.load %arg3[%c0_8, %c0_9] : memref<1x128xf32, #tpu.memory_space<vmem>>, vector<1x128xf32>
      %9 = arith.mulf %7, %7 : vector<32x128xf32>
      %cst_10 = arith.constant dense<0.000000e+00> : vector<32xf32>
      %10 = vector.multi_reduction <add>, %9, %cst_10 [1] : vector<32x128xf32> to vector<32xf32>
      %11 = vector.shape_cast %10 : vector<32xf32> to vector<32x1xf32>
      %cst_11 = arith.constant 1.280000e+02 : f32
      %12 = vector.broadcast %cst_11 : f32 to vector<32x1xf32>
      %13 = arith.divf %11, %12 : vector<32x1xf32>
      %cst_12 = arith.constant 9.99999974E-6 : f32
      %14 = vector.broadcast %cst_12 : f32 to vector<32x1xf32>
      %15 = arith.addf %13, %14 : vector<32x1xf32>
      %16 = math.rsqrt %15 : vector<32x1xf32>
      %17 = vector.broadcast %16 : vector<32x1xf32> to vector<32x128xf32>
      %18 = arith.mulf %7, %17 : vector<32x128xf32>
      %19 = vector.broadcast %8 : vector<1x128xf32> to vector<32x128xf32>
      %20 = arith.mulf %18, %19 : vector<32x128xf32>
      %21 = arith.truncf %20 : vector<32x128xf32> to vector<32x128xbf16>
      %c0_13 = arith.constant 0 : index
      %c0_14 = arith.constant 0 : index
      %22 = vector.load %arg6[%c0_13, %c0_14] : memref<32x128xbf16, #tpu.memory_space<vmem>>, vector<32x128xbf16>
      tpu.vector_store %arg6[%c0_13, %c0_14], %21 {strides = array<i32>} : memref<32x128xbf16, #tpu.memory_space<vmem>>, vector<32x128xbf16>,
    } else {
    }
    %c0 = arith.constant 0 : index
    %c0_1 = arith.constant 0 : index
    %3 = vector.load %arg6[%c0, %c0_1] : memref<32x128xbf16, #tpu.memory_space<vmem>>, vector<32x128xbf16>
    %c0_2 = arith.constant 0 : index
    %c0_3 = arith.constant 0 : index
    %4 = vector.load %arg4[%c0_2, %c0_3] : memref<128x128xbf16, #tpu.memory_space<vmem>>, vector<128x128xbf16>
    %cst = arith.constant dense<0.000000e+00> : vector<32x128xf32>
    %5 = tpu.matmul %3, %4, %cst {dimension_numbers = #tpu.dot_dimension_numbers<[1], [1], [0], [0], [0, 0, 1, 0], [], []>} : vector<32x128xbf16>, vector<128x128xbf16>, vector<32x128xf32> -> vector<32x128xf32>
    %c0_4 = arith.constant 0 : index
    %c0_5 = arith.constant 0 : index
    %6 = vector.load %arg5[%c0_4, %c0_5] : memref<32x128xf32, #tpu.memory_space<vmem>>, vector<32x128xf32>
    tpu.vector_store %arg5[%c0_4, %c0_5], %5 {strides = array<i32>} : memref<32x128xf32, #tpu.memory_space<vmem>>, vector<32x128xf32>,
    return
  }
  func.func @transform_0(%arg0: i32, %arg1: i32) -> (i32, i32) {
    %c0_i32 = arith.constant 0 : i32
    %c0_i32_0 = arith.constant 0 : i32
    return %arg0, %c0_i32 : i32, i32
  }
  func.func @transform_1(%arg0: i32, %arg1: i32) -> (i32, i32) {
    %c0_i32 = arith.constant 0 : i32
    %c0_i32_0 = arith.constant 0 : i32
    %c0_i32_1 = arith.constant 0 : i32
    return %c0_i32, %c0_i32_0 : i32, i32
  }
  func.func @transform_2(%arg0: i32, %arg1: i32) -> (i32, i32) {
    %c0_i32 = arith.constant 0 : i32
    %c0_i32_0 = arith.constant 0 : i32
    return %arg1, %c0_i32 : i32, i32
  }
  func.func @transform_3(%arg0: i32, %arg1: i32) -> (i32, i32) {
    %c0_i32 = arith.constant 0 : i32
    return %arg0, %arg1 : i32, i32
  }
}

</mosaic_0001>

<bundles_post_ra>
// kernel: tpu_custom_call.1
= control target key start
LH: loop header
LB: loop body
LE: loop exit
PB: predicated region body
PF: predicated region fallthrough
CT: control target
= control target key end

     0   :  { %8 = vsyncpa [#allocation4], 0  ;;  %s1082_s0 = inlined_call_operand.hbm [shape: f32[32,128], index: 0, kind: input, shape index: {}]   ;;  %s1083_s1 = inlined_call_operand.vmem [shape: f32[1,128], index: 1, kind: input, shape index: {}]   ;;  %s1084_s2 = inlined_call_operand.hbm [shape: bf16[512,128], index: 2, kind: input, shape index: {}]   ;;  %s1085_s3 = inlined_call_operand.hbm [shape: f32[32,512], index: 3, kind: output, shape index: {}]  }
   0x1   :  { %9 = vsyncpa [#allocation7], 0 }
   0x2   :  { %11 = vsyncpa [#allocation7 + $0x1], 0 }
   0x3   :  { %12 = vsyncpa [#allocation5], 0 }
   0x4   :  { %14 = vsyncpa [#allocation5 + $0x1], 0  ;;  %s843_s12 = smov 0   ;;  %s845_s13 = smov 0  }
   0x5   :  { %s847_s14 = smov 0   ;;  %s849_s15 = smov 0  }
   0x6   :  { %s851_s16 = smov 0   ;;  %s853_s17 = smov 0  }
   0x7 LB: > { %s514_s18 = sadd.s32 4294967295, %s811_s17   ;;  %s515_s19 = sadd.s32 4294967294, %s811_s17   ;;  %s811_s17 = sphi %s853_s17, %s20_s17   ;;  %s807_s16 = sphi %s851_s16, %s1108_s16   ;;  %s803_s15 = sphi %s849_s15, %s1107_s15   ;;  %s799_s14 = sphi %s847_s14, %s1106_s14   ;;  %s795_s13 = sphi %s845_s13, %s1105_s13   ;;  %s791_s12 = sphi %s843_s12, %s1104_s12  }
   0x8   : > { %p99_p0 = scmp.ne.s32.totalorder %s795_s13, %s791_s12  ;;  %p877_p1 = scmp.eq.s32.totalorder %s514_s18, 0 }
   0x9   : > { %p881_p2 = scmp.eq.s32.totalorder %s514_s18, 3  ;;  %p131_p3 = scmp.eq.s32.totalorder %s515_s19, 3 }
   0xa   : > { %s1090_s20 = scalar_select %p877_p1, 1, 0 }
   0xb   : > { %s1091_s21 = scalar_select %p881_p2, 1, 0 }
   0xc   : > { %p887_p4 = por %p877_p1, %p99_p0  ;;  %p516_p5 = scmp.ge.s32.totalorder %s811_s17, 1 }
   0xd   : > { %p892_p6 = por %p131_p3, %p99_p0  ;;  %p138_p7 = scmp.lt.s32.totalorder %s811_s17, 5 }
   0xe   : > { %s1092_s22 = scalar_select %p887_p4, 1, 0 }
   0xf   : > { %s1093_s23 = scalar_select %p892_p6, 1, 0 }
  0x10   : > { %p897_p8 = pnand %p516_p5, %p138_p7  ;;  %s813_s25 = smov [#allocation3]  }
  0x11   : > { %s153_s26 = sshll.u32 %s813_s25, 4  ;;  %s29_s28 = sadd.s32 1, %s807_s16  ;;  %s154_s26 = int_to_ptr.vmem [resolvable:$true] %s153_s26 }
  0x12   : > { %s1094_s24 = scalar_select %p897_p8, 1, 0 }
  0x13   : > { %p579_p9 = pneg %p897_p8  ;;  %s667_s4 = scalar_lea.hbm %s1082_s0, 512 }
  0x14   : > { %p668_p11 = scmp.ne.s32.totalorder %s1082_s0, %s667_s4  ;;  %p674_p3 = scmp.lt.u32.totalorder %s667_s4, %s1082_s0 }
  0x15   : > { %p905_p10 = pnand %p579_p9, %p877_p1 }
  0x17   : > { %p669_p12 = pneg %p905_p10 }
  0x19   : > { %p670_p13 = pnand %p669_p12, %p668_p11 }
  0x1b   : > { %p671_p0 = pneg %p670_p13 }
  0x1d   : > { %p676_p5 = pnand %p674_p3, %p671_p0 }
  0x1f   : > { %679 = shalt.err (!%p676_p5)
}
  0x20   : > { %s680_s9 = scalar_lea.vmem %s154_s26, 512  ;;  %p688_p4 = scmp.lt.s32.totalorder %s154_s26, %s154_s26 }
  0x21   : > { %p681_p7 = scmp.ne.s32.totalorder %s154_s26, %s680_s9  ;;  %p689_p1 = scmp.lt.s32.totalorder %s680_s9, %s680_s9 }
  0x23   : > { %p683_p9 = pnand %p681_p7, %p669_p12  ;;  %p690_p8 = por %p689_p1, %p688_p4 }
  0x25   : > { %p684_p6 = pneg %p683_p9 }
  0x27   : > { %p691_p2 = pnand %p690_p8, %p684_p6 }
  0x29   : > { %694 = shalt.err (!%p691_p2)
}
  0x2a   : > { %s814_s10 = smov 128   ;;  %s815_s11 = smov 8  }
  0x2b   : > { %582 = dma.hbm_to_vmem [thread:$0]  (!%p905_p10), %s1082_s0, 512, %s154_s26, [#allocation4], %s814_s10, %s814_s10, %s815_s11  }
  0x2c   : > { %p30_p1 = scmp.ge.s32.totalorder %s29_s28, 4  ;;  %s86_s25 = sadd.s32 1, %s799_s14 }
  0x2d   : > { %p93_p2 = scmp.ne.s32.totalorder %s799_s14, %s795_s13  ;;  %p94_p4 = scmp.eq.s32.totalorder %s811_s17, 0 }
  0x2e   : > { %s1110_s28 = smov (%p30_p1, %s29_s28), 0  ;;  %p1097_p8 = scmp.ne.s32.totalorder %s1091_s21, 0 }
  0x2f   : > { %p932_p6 = por %p94_p4, %p93_p2  ;;  %s83_s27 = ssub.s32 %s807_s16, %s1110_s28 }
  0x30   : > { %p938_p11 = por %p1097_p8, %p93_p2  ;;  %p592_p12 = scmp.lt.s32.totalorder %s811_s17, 4 }
  0x31   : > { %p84_p10 = scmp.eq.s32.totalorder %s83_s27, 0  ;;  %s170_s26 = sand.u32 1, %s799_s14  }
  0x32   : > { %s519_s4 = sshll.u32 %s170_s26, 6  ;;  %s540_s6 = sshll.u32 %s807_s16, 10 }
  0x33   : > { %s947_s5 = scalar_select %p84_p10, %s799_s14, %s86_s25  }
  0x34   : > { %s953_s9 = scalar_lea.hbm %s1084_s2, %s540_s6  ;;  %s174_s21 = scalar_lea.vmem [#allocation6], %s519_s4 }
  0x35   : > { %s181_s10 = sshll.u32 %s174_s21, 4  ;;  %p959_p13 = pnand %p592_p12, %p932_p6  ;;  %s955_s10 = int_to_ptr.vmem [resolvable:$true] %s181_s10 }
  0x36   : > { %s963_s18 = scalar_lea.sflag [#allocation7], %s170_s26  ;;  %s695_s19 = scalar_lea.hbm %s953_s9, 1024 }
  0x37   : > { %p696_p0 = scmp.ne.s32.totalorder %s953_s9, %s695_s19  ;;  %p697_p3 = pneg %p959_p13 }
  0x38   : > { %s700_s29 = scalar_lea.hbm %s1084_s2, 4096  ;;  %p701_p9 = scmp.lt.u32.totalorder %s953_s9, %s1084_s2 }
  0x39   : > { %p698_p5 = pnand %p697_p3, %p696_p0  ;;  %p702_p1 = scmp.lt.u32.totalorder %s700_s29, %s695_s19 }
  0x3a   : > { %p704_p4 = scmp.lt.u32.totalorder %s695_s19, %s953_s9 }
  0x3b   : > { %p699_p7 = pneg %p698_p5  ;;  %p703_p2 = por %p702_p1, %p701_p9 }
  0x3d   : > { %p705_p6 = por %p704_p4, %p703_p2 }
  0x3f   : > { %p706_p8 = pnand %p705_p6, %p699_p7 }
  0x41   : > { %709 = shalt.err (!%p706_p8)
}
  0x42   : > { %s710_s26 = scalar_lea.vmem %s955_s10, 1024  ;;  %s816_s7 = smov [#allocation6]  }
  0x43   : > { %p711_p12 = scmp.ne.s32.totalorder %s955_s10, %s710_s26  ;;  %s715_s8 = sshll.u32 %s816_s7, 4  ;;  %s716_s8 = int_to_ptr.vmem [resolvable:$false] %s715_s8 }
  0x44   : > { %s717_s21 = scalar_lea.vmem %s716_s8, 2048  ;;  %p718_p5 = scmp.lt.s32.totalorder %s955_s10, %s716_s8 }
  0x45   : > { %p713_p10 = pnand %p711_p12, %p697_p3  ;;  %p719_p9 = scmp.lt.s32.totalorder %s717_s21, %s710_s26 }
  0x47   : > { %p714_p0 = pneg %p713_p10  ;;  %p720_p1 = por %p719_p9, %p718_p5 }
  0x49   : > { %p721_p2 = pnand %p720_p1, %p714_p0 }
  0x4b   : > { %724 = shalt.err (!%p721_p2)
}
  0x4c   : > { %s817_s19 = smov 64   ;;  %s818_s25 = smov 4  }
  0x4d   : > { %586 = dma.hbm_to_vmem [thread:$0]  (!%p959_p13), %s953_s9, 1024, %s955_s10, %s963_s18, %s817_s19, %s817_s19, %s818_s25  }
  0x4e   : > { %p1100_p3 = scmp.ne.s32.totalorder %s1094_s24, 0 }
  0x4f   : > { %p1101_p7 = scmp.ne.s32.totalorder (!%p1100_p3), %s1090_s20, 0 }
  0x50   : > { %193 = sbr.rel (%p1100_p3) target bundleno = 561 (0x231), region = 32 }
  0x57   : > { %778 = dma.done.wait (%p1101_p7), [#allocation4], 512  }
  0x58   : > { %780 = vsyncadd (%p1101_p7), [#allocation4], 4294966784  ;;  %s998_s27 = sand.u32 1, %s795_s13   ;;  %p1102_p13 = scmp.ne.s32.totalorder %s1092_s22, 0 }
  0x59   : > { %s524_s29 = sshll.u32 %s998_s27, 6  ;;  %s200_s4 = scalar_lea.sflag [#allocation7], %s998_s27 }
  0x5a   : > { %s1002_s6 = scalar_lea.vmem [#allocation6], %s524_s29 }
  0x5b   : > { %782 = dma.done.wait (%p1102_p13), %s200_s4, 1024  }
  0x5c   : > { %784 = vsyncadd (%p1102_p13), %s200_s4, 4294966272  ;;  %s525_s24 = sshll.u32 %s998_s27, 5  ;;  %p526_p4 = scmp.ne.s32.totalorder %s803_s15, 0 }
  0x5d   : > { %s1009_s9 = scalar_lea.vmem [#allocation8], %s525_s24  ;;  %v236_v0 = vld [vmem:[#allocation3 + $0x10] sm:$0xff] (!%p526_p4)  ;;  %v234_v1 = vld [vmem:[#allocation3] sm:$0xff] (!%p526_p4)  ;;  %v237_v2 = vld [vmem:[#allocation3 + $0x18] sm:$0xff] (!%p526_p4) }
  0x5e   : > { %233 = sbr.rel (%p526_p4) target bundleno = 265 (0x109), region = 44  ;;  %v241_v3 = vmul.f32 (!%p526_p4), %v236_v0, %v236_v0  ;;  %v239_v4 = vmul.f32 (!%p526_p4), %v234_v1, %v234_v1  ;;  %v235_v5 = vld [vmem:[#allocation3 + $0x8] sm:$0xff] (!%p526_p4)  ;;  %v242_v6 = vmul.f32 (!%p526_p4), %v237_v2, %v237_v2  ;;  %v527_v24 = vld [vmem:[%s1083_s1] ss:$0 sm:$0xff] (!%p526_p4) }
  0x5f   : > { %v240_v7 = vmul.f32 (!%p526_p4), %v235_v5, %v235_v5 }
  0x60   : > { %247 = vadd.xlane.f32.xlu1 (!%p526_p4), %v241_v3  ;;  %243 = vadd.xlane.f32.xlu0 (!%p526_p4), %v239_v4 }
  0x64   : > { %249 = vadd.xlane.f32.xlu1 (!%p526_p4), %v242_v6  ;;  %245 = vadd.xlane.f32.xlu0 (!%p526_p4), %v240_v7 }
  0xed   : > { %v248_v8 = vpop.xlane.xlu1 %247  ;;  %v244_v9 = vpop.xlane.xlu0 %243 }
  0xee   : > { %v254_v10 = vmul.f32 0.0078125, %v248_v8  ;;  %v252_v11 = vmul.f32 0.0078125, %v244_v9 }
  0xf0   : > { %v258_v12 = vadd.f32 1e-05, %v254_v10  ;;  %v256_v13 = vadd.f32 1e-05, %v252_v11 }
  0xf1   : > { %v250_v14 = vpop.xlane.xlu1 %249  ;;  %v246_v15 = vpop.xlane.xlu0 %245 }
  0xf2   : > { %651 = vrsqrt.f32 %v258_v12  ;;  %v255_v16 = vmul.f32 0.0078125, %v250_v14  ;;  %v253_v17 = vmul.f32 0.0078125, %v246_v15 }
  0xf3   : > { %653 = vrsqrt.f32 %v256_v13 }
  0xf4   : > { %v259_v18 = vadd.f32 1e-05, %v255_v16  ;;  %v257_v19 = vadd.f32 1e-05, %v253_v17 }
  0xf6   : > { %655 = vrsqrt.f32 %v259_v18 }
  0xf7   : > { %657 = vrsqrt.f32 %v257_v19 }
  0xfc   : > { %v652_v20 = vpop.eup %651 }
  0xfd   : > { %v654_v21 = vpop.eup %653  ;;  %v266_v22 = vmul.f32 %v652_v20, %v236_v0 }
  0xfe   : > { %v264_v25 = vmul.f32 %v654_v21, %v234_v1 }
  0xff   : > { %v276_v29 = vmul.f32 %v527_v24, %v266_v22 }
 0x100   : > { %v656_v23 = vpop.eup %655  ;;  %v274_v31 = vmul.f32 %v527_v24, %v264_v25 }
 0x101   : > { %v658_v26 = vpop.eup %657  ;;  %v267_v27 = vmul.f32 %v656_v23, %v237_v2 }
 0x102   : > { %v265_v28 = vmul.f32 %v658_v26, %v235_v5 }
 0x103   : > { %v277_v30 = vmul.f32 %v527_v24, %v267_v27 }
 0x104   : > { %v275_v32 = vmul.f32 %v527_v24, %v265_v28 }
 0x105   : > { %v279_v33 = vpack.c.bf16 %v277_v30, %v276_v29 }
 0x106   : > { %v278_v34 = vpack.c.bf16 %v275_v32, %v274_v31 }
 0x107   : > { %281 = vst [vmem:[#allocation2 + $0x8] sm:$0xff] %v279_v33 }
 0x108   : > { %280 = vst [vmem:[#allocation2] sm:$0xff] %v278_v34 }
 0x109 PF: > { %v659_v35 = vld [vmem:[%s1002_s6] sm:$0xff]   ;;  %v660_v36 = vld [vmem:[%s1002_s6 + $0x8] sm:$0xff]   ;;  %v661_v37 = vld [vmem:[%s1002_s6 + $0x10] sm:$0xff]   ;;  %s537_s10 = sshll.u32 %s803_s15, 7  ;;  %s417_s11 = sshll.u32 %s1009_s9, 4  ;;  %s1031_s11 = int_to_ptr.vmem [resolvable:$true] %s417_s11 }
 0x10a   : > { %551 = vmatprep.subr.bf16.mxu0 %v659_v35  ;;  %v662_v39 = vld [vmem:[%s1002_s6 + $0x18] sm:$0xff]   ;;  %v663_v40 = vld [vmem:[%s1002_s6 + $0x20] sm:$0xff]   ;;  %v664_v41 = vld [vmem:[%s1002_s6 + $0x28] sm:$0xff]   ;;  %s1028_s7 = scalar_lea.hbm %s1085_s3, %s537_s10  ;;  %s402_s15 = scalar_lea.sflag [#allocation5], %s998_s27 }
 0x10b   : > { %552 = vmatpush3.bf16.xpose.msra.mxu0 %v659_v35  ;;  %v665_v42 = vld [vmem:[%s1002_s6 + $0x30] sm:$0xff]   ;;  %v666_v43 = vld [vmem:[%s1002_s6 + $0x38] sm:$0xff]   ;;  %s725_s8 = scalar_lea.vmem %s1031_s11, 512  ;;  %s819_s21 = smov [#allocation8]  }
 0x10c   : > { %553 = vmatprep.subr.bf16.mxu0 %v660_v36  ;;  %p726_p6 = scmp.ne.s32.totalorder %s1031_s11, %s725_s8  ;;  %s729_s19 = sshll.u32 %s819_s21, 4  ;;  %s730_s19 = int_to_ptr.vmem [resolvable:$false] %s729_s19 }
 0x10d   : > { %s731_s25 = scalar_lea.vmem %s730_s19, 1024  ;;  %p732_p10 = scmp.lt.s32.totalorder %s1031_s11, %s730_s19 }
 0x10e   : > { %v283_v44 = vld [vmem:[#allocation2 + $0x8] sm:$0xff]  ;;  %p727_p8 = pnand %p726_p6, %p938_p11  ;;  %p733_p0 = scmp.lt.s32.totalorder %s731_s25, %s725_s8 }
 0x10f   : > { %v282_v38 = vld [vmem:[#allocation2] sm:$0xff] }
 0x110   : > { %567 = vmatprep.mubr.bf16.mxu0 %v282_v38  ;;  %p728_p12 = pneg %p727_p8  ;;  %p734_p5 = por %p733_p0, %p732_p10 }
 0x112   : > { %p735_p9 = pnand %p734_p5, %p728_p12 }
 0x113   : > { %554 = vmatpush3.bf16.xpose.msra.mxu0 %v660_v36 }
 0x114   : > { %555 = vmatprep.subr.bf16.mxu0 %v661_v37 }
 0x11b   : > { %556 = vmatpush3.bf16.xpose.msra.mxu0 %v661_v37 }
 0x11c   : > { %557 = vmatprep.subr.bf16.mxu0 %v662_v39 }
 0x123   : > { %558 = vmatpush3.bf16.xpose.msra.mxu0 %v662_v39 }
 0x124   : > { %559 = vmatprep.subr.bf16.mxu0 %v663_v40 }
 0x12b   : > { %560 = vmatpush3.bf16.xpose.msra.mxu0 %v663_v40 }
 0x12c   : > { %561 = vmatprep.subr.bf16.mxu0 %v664_v41 }
 0x133   : > { %562 = vmatpush3.bf16.xpose.msra.mxu0 %v664_v41 }
 0x134   : > { %563 = vmatprep.subr.bf16.mxu0 %v665_v42 }
 0x13b   : > { %564 = vmatpush3.bf16.xpose.msra.mxu0 %v665_v42 }
 0x13c   : > { %565 = vmatprep.subr.bf16.mxu0 %v666_v43 }
 0x143   : > { %566 = vmatpush3.bf16.xpose.msra.mxu0 %v666_v43 }
 0x14a   : > { %568 = vmatmul.mubr.bf16.vlgmr.msra.gmra.mrb[0].mxu0 %v283_v44 }
 0x21d   : > { %v569_v45 = vpop.f32.mrb[0].mxu0 }
 0x21e   : > { %399 = vst [vmem:[%s1009_s9 + $0x10] sm:$0xff] %v569_v45  ;;  %v382_v46 = vpop.f32.mrb[1].mxu0 }
 0x21f   : > { %397 = vst [vmem:[%s1009_s9] sm:$0xff] %v382_v46  ;;  %v570_v47 = vpop.f32.mrb[2].mxu0 }
 0x220   : > { %400 = vst [vmem:[%s1009_s9 + $0x18] sm:$0xff] %v570_v47  ;;  %v385_v48 = vpop.f32.mrb[3].mxu0 }
 0x221   : > { %398 = vst [vmem:[%s1009_s9 + $0x8] sm:$0xff] %v385_v48 }
 0x222   : > { %738 = shalt.err (!%p735_p9)
}
 0x223   : > { %s739_s29 = scalar_lea.hbm %s1028_s7, 512  ;;  %s743_s24 = scalar_lea.hbm %s1085_s3, 2048 }
 0x224   : > { %p740_p1 = scmp.ne.s32.totalorder %s1028_s7, %s739_s29  ;;  %p744_p7 = scmp.lt.u32.totalorder %s1028_s7, %s1085_s3 }
 0x225   : > { %p745_p13 = scmp.lt.u32.totalorder %s743_s24, %s739_s29  ;;  %p747_p6 = scmp.lt.u32.totalorder %s739_s29, %s1028_s7 }
 0x226   : > { %p741_p2 = pnand %p740_p1, %p938_p11 }
 0x227   : > { %p746_p4 = por %p745_p13, %p744_p7 }
 0x228   : > { %p742_p3 = pneg %p741_p2 }
 0x229   : > { %p748_p8 = por %p747_p6, %p746_p4 }
 0x22b   : > { %p749_p12 = pnand %p748_p8, %p742_p3 }
 0x22d   : > { %752 = shalt.err (!%p749_p12)
}
 0x22e   : > { %s820_s22 = smov 128   ;;  %s821_s10 = smov 512  }
 0x22f   : > { %s822_s18 = smov 8  }
 0x230   : > { %577 = dma.vmem_to_hbm [thread:$0]  (%p938_p11), %s1031_s11, 512, %s1028_s7, %s402_s15, %s820_s22, %s821_s10, %s822_s18  }
 0x231 PF: > { %p594_p10 = scmp.ge.s32.totalorder %s811_s17, 2  ;;  %s432_s26 = sand.u32 1, %s791_s12  }
 0x232   : > { %p1103_p0 = scmp.ne.s32.totalorder %s1093_s23, 0  ;;  %s433_s8 = scalar_lea.sflag [#allocation5], %s432_s26 }
 0x234   : > { %p588_p5 = pnand %p594_p10, %p1103_p0 }
 0x236   : > { %786 = dma.done.wait (!%p588_p5), %s433_s8, 512  }
 0x237   : > { %788 = vsyncadd (!%p588_p5), %s433_s8, 4294966784  ;;  %s20_s17 = sadd.s32 1, %s811_s17   ;;  %s1104_s12 = smov %s795_s13 }
 0x238   : > { %p17_p9 = scmp.ge.s32.totalorder %s20_s17, 6   ;;  %s1105_s13 = smov %s799_s14 }
 0x239   : > { %s1106_s14 = smov %s947_s5  ;;  %s1107_s15 = smov %s807_s16 }
 0x23a   : > { %s1108_s16 = smov %s1110_s28  ;;  %19 = sbr.rel (!%p17_p9) target bundleno = 7 (0x7), region = 87 }
 0x241   :  { %438 = vsyncpa [#allocation4], 1 }
 0x242   :  { %440 = vsyncpa [#allocation4 + $0x1], 1 }
 0x243   :  { %441 = vsyncpa [#allocation7], 1 }
 0x244   :  { %443 = vsyncpa [#allocation7 + $0x1], 1 }
 0x245   :  { %444 = vsyncpa [#allocation5], 1 }
 0x246   :  { %446 = vsyncpa [#allocation5 + $0x1], 1 }

</bundles_post_ra>
